<compile_context>
chip_gen: v7x
topology: tpu7x:2x2x1
jax: 0.10.0
libtpu: 0.0.40
codegen_flags: <defaults>
</compile_context>

<pallas_src>
import functools

import jax
import jax.numpy as jnp
from jax.experimental import pallas as pl
from jax.experimental.pallas import tpu as pltpu

_MIB = 1024 * 1024


@functools.lru_cache(maxsize=1)
def _vmem_capacity_bytes():
    """Physical VMEM per TensorCore; conservative 64 MiB (v7x) fallback."""
    try:
        return int(pltpu.get_tpu_info().vmem_capacity_bytes)
    except Exception:
        return 64 * _MIB


# --------------------------------------------------------------------------- #
# Fused single-pass kernel: one batch element = one (C, HW) slab per grid step.
# --------------------------------------------------------------------------- #
def _ca_fused_kernel(x_ref, w_ref, b_ref, o_ref, *, hw, chunk):
    # x_ref: (1, C, HW) input dtype; w_ref: (C, C) f32; b_ref: (C, 1) f32.
    C = x_ref.shape[1]
    n_full = hw // chunk
    rem = hw - n_full * chunk

    # Strip-wise global-average pool: accumulate f32 sums over `chunk`-lane
    # strips so we never materialize a full f32 copy of the slab.
    acc = jnp.zeros((C, 1), jnp.float32)
    if n_full > 0:
        def body(i, a):
            off = pl.multiple_of(i * chunk, chunk)
            xs = x_ref[0, :, pl.ds(off, chunk)].astype(jnp.float32)
            return a + jnp.sum(xs, axis=1, keepdims=True)
        acc = jax.lax.fori_loop(0, n_full, body, acc)
    if rem > 0:
        xs = x_ref[0, :, pl.ds(n_full * chunk, rem)].astype(jnp.float32)
        acc = acc + jnp.sum(xs, axis=1, keepdims=True)

    pooled = acc * (1.0 / hw)                                          # (C, 1) f32
    # 1x1 conv on the pooled vector == (C,C) @ (C,1) + bias.  Tiny; cost is
    # negligible and hidden behind the slab traffic.
    fc = jnp.dot(w_ref[...], pooled,
                 preferred_element_type=jnp.float32) + b_ref[...]      # (C, 1)
    scale = jnp.clip((fc + 3.0) * (1.0 / 6.0), 0.0, 1.0)               # hardsigmoid
    # Broadcast multiply in the INPUT dtype (no full-slab f32 upcast).
    x = x_ref[0]
    o_ref[0] = (x * scale.astype(x.dtype)).astype(o_ref.dtype)


# --------------------------------------------------------------------------- #
# Two-pass kernels (used when the full (C, HW) slab does not fit / small B).
# --------------------------------------------------------------------------- #
def _ca_pool_kernel(x_ref, sum_ref, *, hw, thw, n_inner, mask):
    # x_ref: (1, C, thw); sum_ref: (1, 1, C, 1) f32 (resident over the t axis).
    c = pl.program_id(1)   # core-split index
    t = pl.program_id(2)   # reduction tile index within the split

    @pl.when(t == 0)
    def _init():
        sum_ref[...] = jnp.zeros_like(sum_ref)

    x = x_ref[0].astype(jnp.float32)                                   # (C, thw)
    if mask:  # compile-time constant: partial / duplicated edge tiles
        lane = jax.lax.broadcasted_iota(jnp.int32, x.shape, 1)
        off = (c * n_inner + t) * thw
        x = jnp.where(off + lane < hw, x, 0.0)
    sum_ref[0, 0] += jnp.sum(x, axis=1, keepdims=True)                 # (C, 1)


def _ca_scale_kernel(x_ref, sums_ref, w_ref, b_ref, o_ref, *, inv_hw, n_split):
    # x_ref: (1, C, thw); sums_ref: (1, n_split, C, 1) f32; w: (C,C); b: (C,1).
    pooled = sums_ref[0, 0]
    for s in range(1, n_split):            # static, n_split <= 2
        pooled = pooled + sums_ref[0, s]
    pooled = pooled * inv_hw                                           # (C, 1)
    # Tiny FC + hardsigmoid folded into the scale pass (w/b stay resident).
    fc = jnp.dot(w_ref[...], pooled,
                 preferred_element_type=jnp.float32) + b_ref[...]      # (C, 1)
    scale = jnp.clip((fc + 3.0) * (1.0 / 6.0), 0.0, 1.0)
    x = x_ref[0]
    o_ref[0] = (x * scale.astype(x.dtype)).astype(o_ref.dtype)


# --------------------------------------------------------------------------- #
# Wrappers
# --------------------------------------------------------------------------- #
def _pick_thw(C, HW, itemsize, budget_bytes):
    """Largest multiple-of-128 HW tile whose ~4 pipeline buffers fit the budget."""
    max_lanes = max(budget_bytes // (4 * C * itemsize), 128)
    thw = (max_lanes // 128) * 128
    thw = max(int(thw), 128)
    thw = min(thw, 32768)          # soft cap only; multi-MiB blocks allowed
    if HW <= thw:
        return HW                  # full-extent block (legal even if not mult of 128)
    return thw


def channel_attention(x, weight, bias, *, force_two_pass=False, thw=None):
    """x: (B, C, H, W); weight: (C, C) or (C, C, 1, 1); bias: (C,)."""
    B, C, H, W = x.shape
    HW = H * W
    itemsize = x.dtype.itemsize

    x_flat = x.reshape(B, C, HW)
    w = weight.reshape(C, C).astype(jnp.float32)
    b_col = bias.reshape(C, 1).astype(jnp.float32)

    # Generation-aware VMEM budgets (128 MiB on v5e/v6e, 64 MiB on v7x).
    vmem_cap = _vmem_capacity_bytes()
    vmem_req_cap = max(vmem_cap - 8 * _MIB, 16 * _MIB)
    fused_budget = (vmem_cap * 3) // 4
    # <= 64 MiB VMEM/TC => v7x-class chip with 2 TensorCores: the single-step
    # fused path has zero DMA/compute overlap and uses one TC at B == 1, so
    # require B >= 2 there and let the tiled path shard across both cores.
    multi_tc_likely = vmem_cap <= 64 * _MIB
    min_b_for_fused = 2 if multi_tc_likely else 1

    # ---- fused single-pass path -------------------------------------------
    blk_full = C * HW * itemsize
    fused_need = 4 * blk_full + 4 * C * C + 2 * _MIB   # 2 in + 2 out buffers + w/b + misc

    if (not force_two_pass) and fused_need <= fused_budget and B >= min_b_for_fused:
        vmem = int(min(fused_need + 6 * _MIB, vmem_req_cap))
        cost = pl.CostEstimate(
            flops=int(2 * B * C * C + 3 * B * C * HW),
            transcendentals=0,
            bytes_accessed=int(2 * B * C * HW * itemsize + 4 * C * C + 4 * C),
        )
        out_flat = pl.pallas_call(
            functools.partial(_ca_fused_kernel, hw=HW, chunk=512),
            out_shape=jax.ShapeDtypeStruct((B, C, HW), x.dtype),
            grid_spec=pltpu.PrefetchScalarGridSpec(
                num_scalar_prefetch=0,
                grid=(B,),
                in_specs=[
                    pl.BlockSpec((1, C, HW), lambda i: (i, 0, 0)),
                    # constant index_map -> weight/bias stay resident in VMEM
                    pl.BlockSpec((C, C), lambda i: (0, 0)),
                    pl.BlockSpec((C, 1), lambda i: (0, 0)),
                ],
                out_specs=pl.BlockSpec((1, C, HW), lambda i: (i, 0, 0)),
            ),
            compiler_params=pltpu.CompilerParams(
                dimension_semantics=("parallel",),
                vmem_limit_bytes=vmem,
            ),
            cost_estimate=cost,
        )(x_flat, w, b_col)
        return out_flat.reshape(B, C, H, W)

    # ---- two-pass tiled path ------------------------------------------------
    tile_budget = max((vmem_cap - 12 * _MIB) // 2, 8 * _MIB)
    if thw is None:
        thw_eff = _pick_thw(C, HW, itemsize, tile_budget)
    else:
        thw_eff = HW if thw >= HW else int(thw)

    n_t = pl.cdiv(HW, thw_eff)
    n_split = 2 if n_t >= 2 else 1          # core split of the reduction
    n_inner = pl.cdiv(n_t, n_split)
    last_blk = n_t - 1
    # Mask needed whenever edge tiles are partial or one split has a
    # duplicated (clamped) tile.
    pool_mask = not (HW % thw_eff == 0 and n_t % n_split == 0)

    blk = C * thw_eff * itemsize
    vmem_tiled = int(min(4 * blk + 4 * _MIB, vmem_req_cap))

    cost_pool = pl.CostEstimate(
        flops=int(B * C * HW),
        transcendentals=0,
        bytes_accessed=int(B * C * HW * itemsize + 4 * B * C * n_split),
    )
    cost_scale = pl.CostEstimate(
        flops=int(B * C * HW + 2 * B * n_t * C * C),
        transcendentals=0,
        bytes_accessed=int(2 * B * C * HW * itemsize + 4 * B * C * n_split
                           + 4 * C * C + 4 * C),
    )

    # Pass 1: per-channel spatial sums, reduction axis last ("arbitrary"),
    # 2-way split of the HW reduction on the "parallel" middle axis so both
    # v7x TensorCores participate even at B == 1.  The block index is clamped
    # so a duplicated tail tile re-reads valid data (it is fully masked).
    sums = pl.pallas_call(
        functools.partial(_ca_pool_kernel, hw=HW, thw=thw_eff,
                          n_inner=n_inner, mask=pool_mask),
        out_shape=jax.ShapeDtypeStruct((B, n_split, C, 1), jnp.float32),
        grid_spec=pltpu.PrefetchScalarGridSpec(
            num_scalar_prefetch=0,
            grid=(B, n_split, n_inner),
            in_specs=[pl.BlockSpec(
                (1, C, thw_eff),
                lambda i, c, t: (i, 0, jnp.minimum(c * n_inner + t, last_blk)))],
            out_specs=pl.BlockSpec((1, 1, C, 1), lambda i, c, t: (i, c, 0, 0)),
        ),
        compiler_params=pltpu.CompilerParams(
            dimension_semantics=("parallel", "parallel", "arbitrary"),
            vmem_limit_bytes=vmem_tiled,
        ),
        cost_estimate=cost_pool,
    )(x_flat)

    # Pass 2: elementwise scale with the tiny FC + hardsigmoid folded in
    # (no intermediate XLA op / HBM round-trip of `scale`).  Both grid axes
    # "parallel" so it shards across both v7x TensorCores even when B == 1.
    out_flat = pl.pallas_call(
        functools.partial(_ca_scale_kernel, inv_hw=1.0 / HW, n_split=n_split),
        out_shape=jax.ShapeDtypeStruct((B, C, HW), x.dtype),
        grid_spec=pltpu.PrefetchScalarGridSpec(
            num_scalar_prefetch=0,
            grid=(B, n_t),
            in_specs=[
                pl.BlockSpec((1, C, thw_eff), lambda i, t: (i, 0, t)),
                pl.BlockSpec((1, n_split, C, 1), lambda i, t: (i, 0, 0, 0)),
                pl.BlockSpec((C, C), lambda i, t: (0, 0)),
                pl.BlockSpec((C, 1), lambda i, t: (0, 0)),
            ],
            out_specs=pl.BlockSpec((1, C, thw_eff), lambda i, t: (i, 0, t)),
        ),
        compiler_params=pltpu.CompilerParams(
            dimension_semantics=("parallel", "parallel"),
            vmem_limit_bytes=vmem_tiled,
        ),
        cost_estimate=cost_scale,
    )(x_flat, sums, w, b_col)

    return out_flat.reshape(B, C, H, W)


# --------------------------------------------------------------------------- #
# Reference + self-test
# --------------------------------------------------------------------------- #
def _reference(x, weight, bias):
    pooled = jnp.mean(x, axis=(2, 3))                         # (B, C)
    fc = pooled @ weight.T + bias                             # (B, C)
    scale = jnp.clip((fc + 3.0) / 6.0, 0.0, 1.0)              # hardsigmoid
    return x * scale[:, :, None, None]


def _make_inputs(B, C, H, W, dtype, seed=0):
    kx, kw, kb = jax.random.split(jax.random.PRNGKey(seed), 3)
    x = jax.random.normal(kx, (B, C, H, W), dtype=jnp.float32).astype(dtype)
    bound = 1.0 / (C ** 0.5)
    weight = jax.random.uniform(kw, (C, C), minval=-bound, maxval=bound,
                                dtype=jnp.float32)
    bias = jax.random.uniform(kb, (C,), minval=-bound, maxval=bound,
                              dtype=jnp.float32)
    return x, weight, bias


if __name__ == "__main__":
    # 1) Small f32, fused single-pass path (B=2 so it is selected on all gens).
    x, w, b = _make_inputs(2, 4, 16, 16, jnp.float32)
    out = jax.block_until_ready(channel_attention(x, w, b))
    ref = _reference(x, w, b)
    assert jnp.allclose(out, ref, atol=1e-5, rtol=1e-5), "fused f32 mismatch"

    # 2) f32, forced two-pass tiled path with a partial edge tile
    #    (HW = 400, thw = 128 -> 4 tiles, last one partially out of bounds).
    x2, w2, b2 = _make_inputs(2, 8, 20, 20, jnp.float32)
    out2 = jax.block_until_ready(
        channel_attention(x2, w2, b2, force_two_pass=True, thw=128))
    ref2 = _reference(x2, w2, b2)
    assert jnp.allclose(out2, ref2, atol=1e-5, rtol=1e-5), "two-pass f32 mismatch"

    # 3) bf16, B=1, forced two-pass: odd tile count (HW=289, thw=128 -> 3 tiles)
    #    exercises the clamped/duplicated tile of the 2-way core-split reduction.
    x3, w3, b3 = _make_inputs(1, 8, 17, 17, jnp.bfloat16)
    out3 = jax.block_until_ready(
        channel_attention(x3, w3, b3, force_two_pass=True, thw=128))
    ref3 = _reference(x3.astype(jnp.float32), w3, b3)
    assert jnp.allclose(out3.astype(jnp.float32), ref3, atol=2e-2, rtol=2e-2), \
        "two-pass bf16 mismatch"

    # 4) bf16, fused path with HW < strip size (remainder-only pooling path).
    x4, w4, b4 = _make_inputs(2, 8, 10, 10, jnp.bfloat16)
    out4 = jax.block_until_ready(channel_attention(x4, w4, b4))
    ref4 = _reference(x4.astype(jnp.float32), w4, b4)
    assert jnp.allclose(out4.astype(jnp.float32), ref4, atol=2e-2, rtol=2e-2), \
        "fused bf16 mismatch"

    # 5) f32, forced two-pass with auto (budget-driven) tile size -> single
    #    full-extent tile, n_split == 1 path.
    x5, w5, b5 = _make_inputs(1, 8, 20, 20, jnp.float32)
    out5 = jax.block_until_ready(channel_attention(x5, w5, b5, force_two_pass=True))
    ref5 = _reference(x5, w5, b5)
    assert jnp.allclose(out5, ref5, atol=1e-5, rtol=1e-5), "two-pass auto-tile mismatch"

    print("KERNEL_OK")
</pallas_src>

<mosaic_0001>
module attributes {stable_mosaic.version = 11 : i64} {
  func.func @_ca_fused_kernel(%arg0: i32, %arg1: memref<1x4x256xf32, #tpu.memory_space<vmem>>, %arg2: memref<4x4xf32, #tpu.memory_space<vmem>>, %arg3: memref<4x1xf32, #tpu.memory_space<vmem>>, %arg4: memref<1x4x256xf32, #tpu.memory_space<vmem>>) attributes {dimension_semantics = [#tpu.dimension_semantics<parallel>], iteration_bounds = array<i64: 2>, scalar_prefetch = 0 : i64, scratch_operands = 0 : i64, tpu.core_type = #tpu.core_type<tc>, window_params = [{transform_indices = @transform_0, window_bounds = array<i64: 1, 4, 256>}, {pipeline_mode = #tpu.pipeline_mode<synchronous>, transform_indices = @transform_1, window_bounds = array<i64: 4, 4>}, {pipeline_mode = #tpu.pipeline_mode<synchronous>, transform_indices = @transform_2, window_bounds = array<i64: 4, 1>}, {transform_indices = @transform_3, window_bounds = array<i64: 1, 4, 256>}]} {
    %cst = arith.constant 0.000000e+00 : f32
    %0 = vector.broadcast %cst : f32 to vector<4x1xf32>
    %c0 = arith.constant 0 : index
    %c0_0 = arith.constant 0 : index
    %c0_1 = arith.constant 0 : index
    %1 = vector.load %arg1[%c0, %c0_0, %c0_1] : memref<1x4x256xf32, #tpu.memory_space<vmem>>, vector<1x4x256xf32>
    %2 = vector.shape_cast %1 : vector<1x4x256xf32> to vector<4x256xf32>
    %cst_2 = arith.constant dense<0.000000e+00> : vector<4xf32>
    %3 = vector.multi_reduction <add>, %2, %cst_2 [1] : vector<4x256xf32> to vector<4xf32>
    %4 = vector.shape_cast %3 : vector<4xf32> to vector<4x1xf32>
    %5 = arith.addf %0, %4 : vector<4x1xf32>
    %cst_3 = arith.constant 3.906250e-03 : f32
    %6 = vector.broadcast %cst_3 : f32 to vector<4x1xf32>
    %7 = arith.mulf %5, %6 : vector<4x1xf32>
    %c0_4 = arith.constant 0 : index
    %c0_5 = arith.constant 0 : index
    %8 = vector.load %arg2[%c0_4, %c0_5] : memref<4x4xf32, #tpu.memory_space<vmem>>, vector<4x4xf32>
    %cst_6 = arith.constant dense<0.000000e+00> : vector<4x1xf32>
    %9 = tpu.matmul %8, %7, %cst_6 {dimension_numbers = #tpu.dot_dimension_numbers<[1], [0], [0], [1], [0, 0, 1, 1], [], []>} : vector<4x4xf32>, vector<4x1xf32>, vector<4x1xf32> -> vector<4x1xf32>
    %c0_7 = arith.constant 0 : index
    %c0_8 = arith.constant 0 : index
    %10 = vector.load %arg3[%c0_7, %c0_8] : memref<4x1xf32, #tpu.memory_space<vmem>>, vector<4x1xf32>
    %11 = arith.addf %9, %10 : vector<4x1xf32>
    %cst_9 = arith.constant 3.000000e+00 : f32
    %12 = vector.broadcast %cst_9 : f32 to vector<4x1xf32>
    %13 = arith.addf %11, %12 : vector<4x1xf32>
    %cst_10 = arith.constant 0.166666672 : f32
    %14 = vector.broadcast %cst_10 : f32 to vector<4x1xf32>
    %15 = arith.mulf %13, %14 : vector<4x1xf32>
    %cst_11 = arith.constant 0.000000e+00 : f32
    %cst_12 = arith.constant 1.000000e+00 : f32
    %16 = vector.broadcast %cst_11 : f32 to vector<4x1xf32>
    %17 = arith.maximumf %16, %15 : vector<4x1xf32>
    %18 = vector.broadcast %cst_12 : f32 to vector<4x1xf32>
    %19 = arith.minimumf %18, %17 : vector<4x1xf32>
    %c0_13 = arith.constant 0 : index
    %c0_14 = arith.constant 0 : index
    %c0_15 = arith.constant 0 : index
    %20 = vector.load %arg1[%c0_13, %c0_14, %c0_15] : memref<1x4x256xf32, #tpu.memory_space<vmem>>, vector<1x4x256xf32>
    %21 = vector.shape_cast %20 : vector<1x4x256xf32> to vector<4x256xf32>
    %22 = vector.broadcast %19 : vector<4x1xf32> to vector<4x256xf32>
    %23 = arith.mulf %21, %22 : vector<4x256xf32>
    %c0_16 = arith.constant 0 : index
    %c0_17 = arith.constant 0 : index
    %c0_18 = arith.constant 0 : index
    %24 = vector.load %arg4[%c0_16, %c0_17, %c0_18] : memref<1x4x256xf32, #tpu.memory_space<vmem>>, vector<1x4x256xf32>
    %25 = vector.shape_cast %24 : vector<1x4x256xf32> to vector<4x256xf32>
    %26 = vector.shape_cast %23 : vector<4x256xf32> to vector<1x4x256xf32>
    tpu.vector_store %arg4[%c0_16, %c0_17, %c0_18], %26 {strides = array<i32>} : memref<1x4x256xf32, #tpu.memory_space<vmem>>, vector<1x4x256xf32>,
    return
  }
  func.func @transform_0(%arg0: i32) -> (i32, i32, i32) {
    %c0_i32 = arith.constant 0 : i32
    %c0_i32_0 = arith.constant 0 : i32
    %c0_i32_1 = arith.constant 0 : i32
    return %arg0, %c0_i32, %c0_i32_0 : i32, i32, i32
  }
  func.func @transform_1(%arg0: i32) -> (i32, i32) {
    %c0_i32 = arith.constant 0 : i32
    %c0_i32_0 = arith.constant 0 : i32
    %c0_i32_1 = arith.constant 0 : i32
    return %c0_i32, %c0_i32_0 : i32, i32
  }
  func.func @transform_2(%arg0: i32) -> (i32, i32) {
    %c0_i32 = arith.constant 0 : i32
    %c0_i32_0 = arith.constant 0 : i32
    %c0_i32_1 = arith.constant 0 : i32
    return %c0_i32, %c0_i32_0 : i32, i32
  }
  func.func @transform_3(%arg0: i32) -> (i32, i32, i32) {
    %c0_i32 = arith.constant 0 : i32
    %c0_i32_0 = arith.constant 0 : i32
    %c0_i32_1 = arith.constant 0 : i32
    return %arg0, %c0_i32, %c0_i32_0 : i32, i32, i32
  }
}

</mosaic_0001>

<bundles_post_ra>
// kernel: tpu_custom_call.1
= control target key start
LH: loop header
LB: loop body
LE: loop exit
PB: predicated region body
PF: predicated region fallthrough
CT: control target
= control target key end

     0   :  { %8 = vsyncpa [#allocation3], 0  ;;  %s753_s0 = inlined_call_operand.hbm [shape: f32[2,4,256], index: 0, kind: input, shape index: {}]   ;;  %s754_s1 = inlined_call_operand.vmem [shape: f32[4,4], index: 1, kind: input, shape index: {}]   ;;  %s755_s2 = inlined_call_operand.vmem [shape: f32[4,1], index: 2, kind: input, shape index: {}]   ;;  %s756_s3 = inlined_call_operand.hbm [shape: f32[2,4,256], index: 3, kind: output, shape index: {}]  }
   0x1   :  { %10 = vsyncpa [#allocation3 + $0x1], 0 }
   0x2   :  { %11 = vsyncpa [#allocation4], 0 }
   0x3   :  { %13 = vsyncpa [#allocation4 + $0x1], 0  ;;  %s582_s12 = smov 0   ;;  %s584_s13 = smov 0  }
   0x4   :  { %s586_s14 = smov 0   ;;  %s588_s15 = smov 0  }
   0x5 LB: > { %s603_s16 = sadd.s32 4294967295, %s554_s15   ;;  %s381_s17 = sadd.s32 4294967294, %s554_s15   ;;  %s554_s15 = sphi %s588_s15, %s771_s15   ;;  %s550_s14 = sphi %s586_s14, %s770_s14   ;;  %s546_s13 = sphi %s584_s13, %s769_s13   ;;  %s542_s12 = sphi %s582_s12, %s768_s12  }
   0x6   : > { %s607_s18 = sadd.s32 1, %s554_s15   ;;  %s26_s19 = sadd.s32 1, %s550_s14 }
   0x7   : > { %s23_s20 = ssub.s32 %s554_s15, %s607_s18  ;;  %p33_p0 = scmp.ne.s32.totalorder %s550_s14, %s546_s13 }
   0x8   : > { %p24_p1 = scmp.eq.s32.totalorder %s23_s20, 0  ;;  %p34_p2 = scmp.eq.s32.totalorder %s554_s15, 0 }
   0x9   : > { %p39_p3 = scmp.ne.s32.totalorder %s546_s13, %s542_s12  ;;  %p40_p4 = scmp.eq.s32.totalorder %s603_s16, 0 }
   0xa   : > { %s619_s21 = scalar_select %p24_p1, %s550_s14, %s26_s19  }
   0xb   : > { %p621_p5 = por %p34_p2, %p33_p0  ;;  %p625_p6 = por %p40_p4, %p39_p3 }
   0xc   : > { %p105_p7 = scmp.eq.s32.totalorder %s603_s16, 1  ;;  %p111_p8 = scmp.eq.s32.totalorder %s381_s17, 1 }
   0xd   : > { %p418_p10 = scmp.lt.s32.totalorder %s554_s15, 2  ;;  %s137_s26 = sand.u32 1, %s550_s14  }
   0xe   : > { %p632_p11 = por %p105_p7, %p33_p0  ;;  %p636_p12 = por %p111_p8, %p39_p3 }
   0xf   : > { %s397_s27 = sshll.u32 %s554_s15, 7  ;;  %s384_s28 = sshll.u32 %s137_s26, 3 }
  0x10   : > { %s760_s24 = scalar_select %p632_p11, 1, 0 }
  0x11   : > { %s761_s25 = scalar_select %p636_p12, 1, 0 }
  0x12   : > { %s645_s4 = scalar_lea.hbm %s753_s0, %s397_s27  ;;  %s141_s5 = scalar_lea.vmem [#allocation2], %s384_s28 }
  0x13   : > { %s149_s6 = sshll.u32 %s141_s5, 4  ;;  %p649_p13 = pnand %p418_p10, %p621_p5  ;;  %s653_s6 = int_to_ptr.vmem [resolvable:$true] %s149_s6 }
  0x14   : > { %s138_s8 = scalar_lea.sflag [#allocation3], %s137_s26  ;;  %s458_s9 = scalar_lea.hbm %s645_s4, 128 }
  0x15   : > { %p459_p2 = scmp.ne.s32.totalorder %s645_s4, %s458_s9  ;;  %p460_p3 = pneg %p649_p13 }
  0x16   : > { %s463_s17 = scalar_lea.hbm %s753_s0, 256  ;;  %p464_p5 = scmp.lt.u32.totalorder %s645_s4, %s753_s0 }
  0x17   : > { %p461_p4 = pnand %p460_p3, %p459_p2  ;;  %p465_p8 = scmp.lt.u32.totalorder %s463_s17, %s458_s9 }
  0x18   : > { %p467_p9 = scmp.lt.u32.totalorder %s458_s9, %s645_s4 }
  0x19   : > { %p462_p7 = pneg %p461_p4  ;;  %p466_p10 = por %p465_p8, %p464_p5 }
  0x1b   : > { %p468_p0 = por %p467_p9, %p466_p10 }
  0x1d   : > { %p469_p1 = pnand %p468_p0, %p462_p7 }
  0x1f   : > { %472 = shalt.err (!%p469_p1)
}
  0x20   : > { %s473_s22 = scalar_lea.vmem %s653_s6, 128  ;;  %s556_s26 = smov [#allocation2]  }
  0x21   : > { %p474_p2 = scmp.ne.s32.totalorder %s653_s6, %s473_s22  ;;  %s478_s27 = sshll.u32 %s556_s26, 4  ;;  %s479_s27 = int_to_ptr.vmem [resolvable:$false] %s478_s27 }
  0x22   : > { %s480_s28 = scalar_lea.vmem %s479_s27, 256  ;;  %p481_p11 = scmp.lt.s32.totalorder %s653_s6, %s479_s27 }
  0x23   : > { %p476_p4 = pnand %p474_p2, %p460_p3  ;;  %p482_p5 = scmp.lt.s32.totalorder %s480_s28, %s473_s22 }
  0x25   : > { %p477_p12 = pneg %p476_p4  ;;  %p483_p8 = por %p482_p5, %p481_p11 }
  0x27   : > { %p484_p9 = pnand %p483_p8, %p477_p12 }
  0x29   : > { %487 = shalt.err (!%p484_p9)
}
  0x2a   : > { %413 = dma.hbm_to_vmem [thread:$0]  (!%p649_p13), %s645_s4, 128, %s653_s6, %s138_s8  }
  0x2b   : > { %p763_p0 = scmp.lt.s32.totalorder %s554_s15, 3  ;;  %p764_p1 = scmp.ge.s32.totalorder %s554_s15, 1 }
  0x2d   : > { %p155_p3 = pnand %p764_p1, %p763_p0 }
  0x2e   : > { %s687_s29 = sand.u32 (!%p155_p3), 1, %s546_s13  }
  0x2f   : > { %158 = sbr.rel (%p155_p3) target bundleno = 574 (0x23e), region = 32  ;;  %s388_s30 = sshll.u32 (!%p155_p3), %s687_s29, 3 }
  0x30   : > { %s161_s5 = scalar_lea.sflag (!%p155_p3), [#allocation3], %s687_s29  ;;  %s164_s7 = scalar_lea.vmem (!%p155_p3), [#allocation2], %s388_s30 }
  0x36   : > { %533 = dma.done.wait (%p625_p6), %s161_s5, 128  }
  0x37   : > { %535 = vsyncadd (%p625_p6), %s161_s5, 4294967168  ;;  %vm191_vm0 = vcmask 1043456   ;;  %v187_v0 = vld [vmem:[%s164_s7] sm:$0xff]  ;;  %v557_v5 = vmov 0.0   ;;  %vm558_vm1 = vmmov 0   ;;  %vm201_vm2 = vcmask 31744  }
  0x38   : > { %v189_v1 = vcombine.high %v187_v0, %v187_v0  ;;  %v192_v2 = vsel %vm191_vm0, %v187_v0, 0.0  ;;  %401 = vmatprep.subr.mxu0 %v557_v5  ;;  %403 = vmatprep.mubr.msk.f32.mxu0 %vm558_vm1, %v557_v5  ;;  %v199_v8 = vld [vmem:[%s754_s1] sm:$0xf]  ;;  %v559_v9 = vmov 0   ;;  %v560_v18 = vmov 839922192  }
  0x39   : > { %456 = vset.pattern.permute.xlu0 %v559_v9  ;;  %v200_v10 = vld [vmem:[%s755_s2] sm:$0xf]  ;;  %v287_v19 = vunpack.c.l.s4 %v560_v18  ;;  %v289_v20 = vlaneseq  ;;  %s398_s9 = sshll.u32 %s603_s16, 7  ;;  %s186_s10 = scalar_lea.vmem [#allocation5], %s388_s30 }
  0x3a   : > { %v193_v3 = vsel %vm191_vm0, %v189_v1, 0.0  ;;  %s311_s11 = sshll.u32 %s186_s10, 4  ;;  %s709_s20 = scalar_lea.hbm %s756_s3, %s398_s9  ;;  %s711_s11 = int_to_ptr.vmem [resolvable:$true] %s311_s11 }
  0x3b   : > { %v194_v4 = vadd.f32 %v193_v3, %v192_v2  ;;  %v288_v21 = vunpack.c.0.s8 %v287_v19  ;;  %v290_v22 = vshrl.u32 %v289_v20, 7  ;;  %s297_s22 = scalar_lea.sflag [#allocation4], %s687_s29  ;;  %s488_s26 = scalar_lea.vmem %s711_s11, 128 }
  0x3c   : > { %p489_p6 = scmp.ne.s32.totalorder %s711_s11, %s488_s26  ;;  %p765_p11 = scmp.ne.s32.totalorder %s760_s24, 0 }
  0x3d   : > { %195 = vadd.xlane.f32.xlu0 %v194_v4  ;;  %v291_v23 = vsub.s32 %v288_v21, %v290_v22  ;;  %s561_s16 = smov [#allocation5]  }
  0x3e   : > { %p490_p12 = pnand %p489_p6, %p765_p11  ;;  %s492_s27 = sshll.u32 %s561_s16, 4  ;;  %s493_s27 = int_to_ptr.vmem [resolvable:$false] %s492_s27 }
  0x3f   : > { %s494_s28 = scalar_lea.vmem %s493_s27, 256  ;;  %p495_p7 = scmp.lt.s32.totalorder %s711_s11, %s493_s27 }
  0x40   : > { %p491_p13 = pneg %p490_p12  ;;  %p496_p10 = scmp.lt.s32.totalorder %s494_s28, %s488_s26 }
  0x42   : > { %p497_p2 = por %p496_p10, %p495_p7 }
  0x44   : > { %p498_p4 = pnand %p497_p2, %p491_p13 }
  0xca   : > { %v196_v6 = vpop.xlane.xlu0 %195 }
  0xcb   : > { %v198_v7 = vmul.f32 0.00390625, %v196_v6 }
  0xcd   : > { %402 = vmatpush3.msk.msra.mxu0 %vm191_vm0, %v198_v7 }
  0xce   : > { %404 = vmatmul.mubr.msk.f32.vlgmr.msra.gmra.mrb[0].mxu0 %vm201_vm2, %v199_v8 }
 0x1a1   : > { %v274_v11 = vpop.f32.mrb[0].mxu0 }
 0x1a2   : > { %v275_v12 = vadd.f32 %v274_v11, %v200_v10  ;;  %v405_v13 = vpop.f32.mrb[1].mxu0 }
 0x1a4   : > { %v278_v14 = vadd.f32 3.0, %v275_v12 }
 0x1a6   : > { %v279_v15 = vmul.f32 0.16666667, %v278_v14 }
 0x1a8   : > { %v280_v16 = vmax.f32 %v279_v15, 0.0 }
 0x1aa   : > { %v281_v17 = vmin.f32 %v280_v16, 1.0 }
 0x1ac   : > { %284 = vperm.xlu0 %456, %v281_v17  }
 0x22b   : > { %v285_v24 = vpop.permute.xlu0 %284 }
 0x22c   : > { %v292_v25 = vrot.slane %v285_v24, %v291_v23 }
 0x22e   : > { %v294_v26 = vmul.f32 %v292_v25, %v187_v0 }
 0x230   : > { %295 = vst [vmem:[%s186_s10] sm:$0xff] %v294_v26 }
 0x231   : > { %501 = shalt.err (!%p498_p4)
}
 0x232   : > { %s502_s29 = scalar_lea.hbm %s709_s20, 128  ;;  %s506_s7 = scalar_lea.hbm %s756_s3, 256 }
 0x233   : > { %p503_p5 = scmp.ne.s32.totalorder %s709_s20, %s502_s29  ;;  %p507_p0 = scmp.lt.u32.totalorder %s709_s20, %s756_s3 }
 0x234   : > { %p508_p1 = scmp.lt.u32.totalorder %s506_s7, %s502_s29  ;;  %p510_p6 = scmp.lt.u32.totalorder %s502_s29, %s709_s20 }
 0x235   : > { %p504_p8 = pnand %p503_p5, %p765_p11 }
 0x236   : > { %p509_p3 = por %p508_p1, %p507_p0 }
 0x237   : > { %p505_p9 = pneg %p504_p8 }
 0x238   : > { %p511_p12 = por %p510_p6, %p509_p3 }
 0x23a   : > { %p512_p13 = pnand %p511_p12, %p505_p9 }
 0x23c   : > { %515 = shalt.err (!%p512_p13)
}
 0x23d   : > { %408 = dma.vmem_to_hbm [thread:$0]  (%p765_p11), %s711_s11, 128, %s709_s20, %s297_s22  }
 0x23e PF: > { %s323_s23 = sand.u32 1, %s542_s12   ;;  %p766_p7 = scmp.ne.s32.totalorder %s761_s25, 0 }
 0x23f   : > { %p767_p10 = scmp.ge.s32.totalorder %s554_s15, 2  ;;  %s324_s8 = scalar_lea.sflag [#allocation4], %s323_s23 }
 0x241   : > { %p415_p2 = pnand %p767_p10, %p766_p7 }
 0x243   : > { %537 = dma.done.wait (!%p415_p2), %s324_s8, 128  }
 0x244   : > { %539 = vsyncadd (!%p415_p2), %s324_s8, 4294967168  ;;  %p16_p4 = scmp.ge.s32.totalorder %s607_s18, 4   ;;  %s768_s12 = smov %s546_s13 }
 0x245   : > { %s769_s13 = smov %s550_s14  ;;  %s770_s14 = smov %s619_s21 }
 0x246   : > { %s771_s15 = smov %s607_s18  ;;  %18 = sbr.rel (!%p16_p4) target bundleno = 5 (0x5), region = 77 }
 0x24d   :  { %329 = vsyncpa [#allocation3], 1 }
 0x24e   :  { %331 = vsyncpa [#allocation3 + $0x1], 1 }
 0x24f   :  { %332 = vsyncpa [#allocation4], 1 }
 0x250   :  { %334 = vsyncpa [#allocation4 + $0x1], 1 }

</bundles_post_ra>
